<compile_context>
chip_gen: v7x
topology: tpu7x:2x2x1
jax: 0.10.0
libtpu: 0.0.40
codegen_flags: <defaults>
</compile_context>

<pallas_src>
import jax
import jax.numpy as jnp
from jax.experimental import pallas as pl
from jax.experimental.pallas import tpu as pltpu


def _round_up(x, m):
    return (x + m - 1) // m * m


def adv_net_kernel(x_ref, w1_ref, b1_ref, w2_ref, b2_ref, w3_ref, o_ref):
    # Layer 1: Linear(in -> hidden) + ReLU. MXU dot in compute dtype, f32 accumulate,
    # bias-add + ReLU in f32.
    h1 = jnp.dot(x_ref[...], w1_ref[...], preferred_element_type=jnp.float32)
    h1 = jnp.maximum(h1 + b1_ref[...], 0.0)
    # (dropout1: identity in eval mode)

    # Layer 2: Linear(hidden -> hidden) + ReLU.
    h2 = jnp.dot(h1.astype(w2_ref.dtype), w2_ref[...],
                 preferred_element_type=jnp.float32)
    h2 = jnp.maximum(h2 + b2_ref[...], 0.0)
    # (dropout2: identity in eval mode)

    # Layer 3: Linear(hidden -> 1). An N=1 MXU matmul would use 1/128-1/256 of the
    # systolic array and force a masked lane-width-1 store, so do it as a VPU
    # multiply + lane reduction and store a lane-dense row of batch results.
    # w3_ref is the transposed weight row (1, hidden), kept in f32.
    y = jnp.sum(h2 * w3_ref[...], axis=-1)                 # (block_b,)
    o_ref[...] = y[None, None, :].astype(o_ref.dtype)      # (1, 1, block_b)


def adversarial_network_forward(x, w1, b1, w2, b2, w3, b3, *,
                                block_b=512, use_bf16=True):
    """Eval-mode forward of AdversarialNetwork.

    x : (B, in_feature) f32; w1: (in, hidden); b1: (1, hidden);
    w2: (hidden, hidden); b2: (1, hidden); w3: (hidden, 1); b3: (1, 1).
    Returns (B, 1) f32.
    """
    B, in_f = x.shape
    hidden = w1.shape[1]

    # Batch tile: multiple of 128 so the (1, 1, block_b) output stores are lane-dense,
    # but no bigger than needed for small B.
    block_b = min(block_b, _round_up(max(B, 1), 128))
    b_pad = _round_up(B, block_b)
    grid_b = b_pad // block_b
    if b_pad != B:
        x = jnp.pad(x, ((0, b_pad - B), (0, 0)))

    compute_dtype = jnp.bfloat16 if use_bf16 else jnp.float32
    x_c = x.astype(compute_dtype)
    w1_c = w1.astype(compute_dtype)
    w2_c = w2.astype(compute_dtype)
    b1_f = b1.astype(jnp.float32)
    b2_f = b2.astype(jnp.float32)
    w3_row = w3.reshape(1, hidden).astype(jnp.float32)  # transposed row for VPU reduce

    # Rough VMEM budget: double-buffered x/out tiles + resident weight blocks +
    # f32 activations + margin. Capped at 64 MiB (v7x physical VMEM).
    itemsize = jnp.dtype(compute_dtype).itemsize
    w_bytes = (in_f * hidden + hidden * hidden) * itemsize + 3 * hidden * 4
    io_bytes = block_b * in_f * itemsize + block_b * 4
    act_bytes = 2 * block_b * hidden * 4
    vmem_limit = int(min(max(2 * (w_bytes + io_bytes) + act_bytes + (2 << 20),
                             16 << 20), 64 << 20))

    grid_spec = pltpu.PrefetchScalarGridSpec(
        num_scalar_prefetch=0,
        grid=(grid_b,),
        in_specs=[
            pl.BlockSpec((block_b, in_f), lambda i: (i, 0)),    # x: tiled over batch
            pl.BlockSpec((in_f, hidden), lambda i: (0, 0)),     # w1: VMEM-resident
            pl.BlockSpec((1, hidden), lambda i: (0, 0)),        # b1
            pl.BlockSpec((hidden, hidden), lambda i: (0, 0)),   # w2
            pl.BlockSpec((1, hidden), lambda i: (0, 0)),        # b2
            pl.BlockSpec((1, hidden), lambda i: (0, 0)),        # w3 (transposed row)
        ],
        out_specs=pl.BlockSpec((1, 1, block_b), lambda i: (i, 0, 0)),
    )

    out = pl.pallas_call(
        adv_net_kernel,
        out_shape=jax.ShapeDtypeStruct((grid_b, 1, block_b), jnp.float32),
        grid_spec=grid_spec,
        compiler_params=pltpu.CompilerParams(
            dimension_semantics=("parallel",),   # shard batch tiles across TCs (v7x)
            vmem_limit_bytes=vmem_limit,
        ),
    )(x_c, w1_c, b1_f, w2_c, b2_f, w3_row)

    # b3 is a single scalar; add it outside the kernel (XLA fuses this) rather than
    # spending a VMEM block + DMA on 4 bytes.
    y = out.reshape(b_pad, 1)[:B] + b3.reshape(1, 1).astype(jnp.float32)
    return y


def init_params(key, in_feature, hidden_size):
    """Deterministic kaiming_normal_ (fan_in, gain=sqrt(2)) weights, zero biases —
    mirrors init_weights() in the PyTorch module. Weights stored as (in, out)."""
    k1, k2, k3 = jax.random.split(key, 3)
    w1 = jax.random.normal(k1, (in_feature, hidden_size), jnp.float32) * jnp.sqrt(2.0 / in_feature)
    b1 = jnp.zeros((1, hidden_size), jnp.float32)
    w2 = jax.random.normal(k2, (hidden_size, hidden_size), jnp.float32) * jnp.sqrt(2.0 / hidden_size)
    b2 = jnp.zeros((1, hidden_size), jnp.float32)
    w3 = jax.random.normal(k3, (hidden_size, 1), jnp.float32) * jnp.sqrt(2.0 / hidden_size)
    b3 = jnp.zeros((1, 1), jnp.float32)
    return w1, b1, w2, b2, w3, b3


if __name__ == "__main__":
    # NOTE: at these toy sizes the kernel is launch/DMA-latency bound; the tiling /
    # bf16 / lane-dense-store structure only pays off at production B and hidden.
    in_feature, hidden_size, batch = 32, 32, 8

    key = jax.random.PRNGKey(0)
    kx, kp = jax.random.split(key)
    x = jax.random.normal(kx, (batch, in_feature), jnp.float32)
    params = init_params(kp, in_feature, hidden_size)

    # Plain-JAX reference.
    w1, b1, w2, b2, w3, b3 = params
    h = jnp.maximum(x @ w1 + b1, 0.0)
    h = jnp.maximum(h @ w2 + b2, 0.0)
    y_ref = h @ w3 + b3

    # Exact-precision path (f32 MXU inputs): tight tolerance.
    y_f32 = jax.block_until_ready(adversarial_network_forward(x, *params, use_bf16=False))
    assert y_f32.shape == (batch, 1)
    assert jnp.allclose(y_f32, y_ref, atol=1e-5, rtol=1e-5)

    # Performance path (bf16 MXU inputs, f32 accumulation): bf16-level tolerance.
    y_bf16 = jax.block_until_ready(adversarial_network_forward(x, *params, use_bf16=True))
    assert y_bf16.shape == (batch, 1)
    assert jnp.allclose(y_bf16, y_ref, atol=5e-2, rtol=5e-2)

    print("KERNEL_OK")
</pallas_src>

<mosaic_0001>
module attributes {stable_mosaic.version = 11 : i64} {
  func.func @adv_net_kernel(%arg0: i32, %arg1: memref<128x32xf32, #tpu.memory_space<vmem>>, %arg2: memref<32x32xf32, #tpu.memory_space<vmem>>, %arg3: memref<1x32xf32, #tpu.memory_space<vmem>>, %arg4: memref<32x32xf32, #tpu.memory_space<vmem>>, %arg5: memref<1x32xf32, #tpu.memory_space<vmem>>, %arg6: memref<1x32xf32, #tpu.memory_space<vmem>>, %arg7: memref<1x1x128xf32, #tpu.memory_space<vmem>>) attributes {dimension_semantics = [#tpu.dimension_semantics<parallel>], iteration_bounds = array<i64: 1>, scalar_prefetch = 0 : i64, scratch_operands = 0 : i64, tpu.core_type = #tpu.core_type<tc>, window_params = [{transform_indices = @transform_0, window_bounds = array<i64: 128, 32>}, {pipeline_mode = #tpu.pipeline_mode<synchronous>, transform_indices = @transform_1, window_bounds = array<i64: 32, 32>}, {pipeline_mode = #tpu.pipeline_mode<synchronous>, transform_indices = @transform_2, window_bounds = array<i64: 1, 32>}, {pipeline_mode = #tpu.pipeline_mode<synchronous>, transform_indices = @transform_3, window_bounds = array<i64: 32, 32>}, {pipeline_mode = #tpu.pipeline_mode<synchronous>, transform_indices = @transform_4, window_bounds = array<i64: 1, 32>}, {pipeline_mode = #tpu.pipeline_mode<synchronous>, transform_indices = @transform_5, window_bounds = array<i64: 1, 32>}, {transform_indices = @transform_6, window_bounds = array<i64: 1, 1, 128>}]} {
    %c0 = arith.constant 0 : index
    %c0_0 = arith.constant 0 : index
    %0 = vector.load %arg1[%c0, %c0_0] : memref<128x32xf32, #tpu.memory_space<vmem>>, vector<128x32xf32>
    %c0_1 = arith.constant 0 : index
    %c0_2 = arith.constant 0 : index
    %1 = vector.load %arg2[%c0_1, %c0_2] : memref<32x32xf32, #tpu.memory_space<vmem>>, vector<32x32xf32>
    %cst = arith.constant dense<0.000000e+00> : vector<128x32xf32>
    %2 = tpu.matmul %0, %1, %cst {dimension_numbers = #tpu.dot_dimension_numbers<[1], [0], [0], [1], [0, 0, 1, 1], [], []>} : vector<128x32xf32>, vector<32x32xf32>, vector<128x32xf32> -> vector<128x32xf32>
    %c0_3 = arith.constant 0 : index
    %c0_4 = arith.constant 0 : index
    %3 = vector.load %arg3[%c0_3, %c0_4] : memref<1x32xf32, #tpu.memory_space<vmem>>, vector<1x32xf32>
    %4 = vector.broadcast %3 : vector<1x32xf32> to vector<128x32xf32>
    %5 = arith.addf %2, %4 : vector<128x32xf32>
    %cst_5 = arith.constant 0.000000e+00 : f32
    %6 = vector.broadcast %cst_5 : f32 to vector<128x32xf32>
    %7 = arith.maximumf %5, %6 : vector<128x32xf32>
    %c0_6 = arith.constant 0 : index
    %c0_7 = arith.constant 0 : index
    %8 = vector.load %arg4[%c0_6, %c0_7] : memref<32x32xf32, #tpu.memory_space<vmem>>, vector<32x32xf32>
    %cst_8 = arith.constant dense<0.000000e+00> : vector<128x32xf32>
    %9 = tpu.matmul %7, %8, %cst_8 {dimension_numbers = #tpu.dot_dimension_numbers<[1], [0], [0], [1], [0, 0, 1, 1], [], []>} : vector<128x32xf32>, vector<32x32xf32>, vector<128x32xf32> -> vector<128x32xf32>
    %c0_9 = arith.constant 0 : index
    %c0_10 = arith.constant 0 : index
    %10 = vector.load %arg5[%c0_9, %c0_10] : memref<1x32xf32, #tpu.memory_space<vmem>>, vector<1x32xf32>
    %11 = vector.broadcast %10 : vector<1x32xf32> to vector<128x32xf32>
    %12 = arith.addf %9, %11 : vector<128x32xf32>
    %cst_11 = arith.constant 0.000000e+00 : f32
    %13 = vector.broadcast %cst_11 : f32 to vector<128x32xf32>
    %14 = arith.maximumf %12, %13 : vector<128x32xf32>
    %c0_12 = arith.constant 0 : index
    %c0_13 = arith.constant 0 : index
    %15 = vector.load %arg6[%c0_12, %c0_13] : memref<1x32xf32, #tpu.memory_space<vmem>>, vector<1x32xf32>
    %16 = vector.broadcast %15 : vector<1x32xf32> to vector<128x32xf32>
    %17 = arith.mulf %14, %16 : vector<128x32xf32>
    %cst_14 = arith.constant dense<0.000000e+00> : vector<128xf32>
    %18 = vector.multi_reduction <add>, %17, %cst_14 [1] : vector<128x32xf32> to vector<128xf32>
    %19 = vector.shape_cast %18 : vector<128xf32> to vector<1x1x128xf32>
    %c0_15 = arith.constant 0 : index
    %c0_16 = arith.constant 0 : index
    %c0_17 = arith.constant 0 : index
    %20 = vector.load %arg7[%c0_15, %c0_16, %c0_17] : memref<1x1x128xf32, #tpu.memory_space<vmem>>, vector<1x1x128xf32>
    tpu.vector_store %arg7[%c0_15, %c0_16, %c0_17], %19 {strides = array<i32>} : memref<1x1x128xf32, #tpu.memory_space<vmem>>, vector<1x1x128xf32>,
    return
  }
  func.func @transform_0(%arg0: i32) -> (i32, i32) {
    %c0_i32 = arith.constant 0 : i32
    %c0_i32_0 = arith.constant 0 : i32
    return %arg0, %c0_i32 : i32, i32
  }
  func.func @transform_1(%arg0: i32) -> (i32, i32) {
    %c0_i32 = arith.constant 0 : i32
    %c0_i32_0 = arith.constant 0 : i32
    %c0_i32_1 = arith.constant 0 : i32
    return %c0_i32, %c0_i32_0 : i32, i32
  }
  func.func @transform_2(%arg0: i32) -> (i32, i32) {
    %c0_i32 = arith.constant 0 : i32
    %c0_i32_0 = arith.constant 0 : i32
    %c0_i32_1 = arith.constant 0 : i32
    return %c0_i32, %c0_i32_0 : i32, i32
  }
  func.func @transform_3(%arg0: i32) -> (i32, i32) {
    %c0_i32 = arith.constant 0 : i32
    %c0_i32_0 = arith.constant 0 : i32
    %c0_i32_1 = arith.constant 0 : i32
    return %c0_i32, %c0_i32_0 : i32, i32
  }
  func.func @transform_4(%arg0: i32) -> (i32, i32) {
    %c0_i32 = arith.constant 0 : i32
    %c0_i32_0 = arith.constant 0 : i32
    %c0_i32_1 = arith.constant 0 : i32
    return %c0_i32, %c0_i32_0 : i32, i32
  }
  func.func @transform_5(%arg0: i32) -> (i32, i32) {
    %c0_i32 = arith.constant 0 : i32
    %c0_i32_0 = arith.constant 0 : i32
    %c0_i32_1 = arith.constant 0 : i32
    return %c0_i32, %c0_i32_0 : i32, i32
  }
  func.func @transform_6(%arg0: i32) -> (i32, i32, i32) {
    %c0_i32 = arith.constant 0 : i32
    %c0_i32_0 = arith.constant 0 : i32
    %c0_i32_1 = arith.constant 0 : i32
    return %arg0, %c0_i32, %c0_i32_0 : i32, i32, i32
  }
}

</mosaic_0001>

<bundles_post_ra>
// kernel: tpu_custom_call.1
= control target key start
LH: loop header
LB: loop body
LE: loop exit
PB: predicated region body
PF: predicated region fallthrough
CT: control target
= control target key end

     0   :  { %vm51_vm0 = vcmask 261120   ;;  %s1124_s0 = inlined_call_operand.vmem [shape: f32[128,32], index: 0, kind: input, shape index: {}]   ;;  %s1125_s1 = inlined_call_operand.vmem [shape: f32[32,32], index: 1, kind: input, shape index: {}]   ;;  %s1126_s2 = inlined_call_operand.vmem [shape: f32[1,32], index: 2, kind: input, shape index: {}]   ;;  %s1127_s3 = inlined_call_operand.vmem [shape: f32[32,32], index: 3, kind: input, shape index: {}]   ;;  %s1128_s4 = inlined_call_operand.vmem [shape: f32[1,32], index: 4, kind: input, shape index: {}]   ;;  %s1129_s5 = inlined_call_operand.vmem [shape: f32[1,32], index: 5, kind: input, shape index: {}]   ;;  %s1130_s6 = inlined_call_operand.hbm [shape: f32[1,1,128], index: 6, kind: output, shape index: {}]  }
   0x1   :  { %v40_v0 = vld [vmem:[%s1125_s1] sm:$0xff]  ;;  %v41_v1 = vld [vmem:[%s1125_s1 + $0x8] sm:$0xff]  ;;  %v42_v2 = vld [vmem:[%s1125_s1 + $0x10] sm:$0xff] }
   0x2   :  { %v834_v3 = vpack.c.bf16 %v41_v1, %v40_v0  ;;  %v43_v4 = vld [vmem:[%s1125_s1 + $0x18] sm:$0xff]  ;;  %v24_v5 = vld [vmem:[%s1124_s0] sm:$0xff]  ;;  %v262_v8 = vld [vmem:[%s1127_s3 + $0x8] sm:$0xff] }
   0x3   :  { %v838_v6 = vpack.c.bf16 %v43_v4, %v42_v2  ;;  %778 = vmatprep.mubr.msk.f32.mxu0 %vm51_vm0, %v24_v5  ;;  %v261_v7 = vld [vmem:[%s1127_s3] sm:$0xff] }
   0x4   :  { %835 = vmatprep.subr.bf16.mxu0 %v834_v3 }
   0x5   :  { %837 = vmatpush3.bf16.msra.mxu0 %v834_v3 }
   0x6   :  { %839 = vmatprep.subr.bf16.mxu0 %v838_v6 }
   0x7   :  { %11 = vsyncpa [#allocation3], 0  ;;  %v25_v9 = vld [vmem:[%s1124_s0 + $0x8] sm:$0xff]  ;;  %v842_v10 = vpack.c.bf16 %v262_v8, %v261_v7  ;;  %v26_v11 = vld [vmem:[%s1124_s0 + $0x10] sm:$0xff]  ;;  %vm579_vm1 = vcmask 130112   ;;  %vm586_vm2 = vcmask 195712  }
   0x8   :  { %v27_v12 = vld [vmem:[%s1124_s0 + $0x18] sm:$0xff]  ;;  %v28_v13 = vld [vmem:[%s1124_s0 + $0x20] sm:$0xff]  ;;  %v29_v14 = vld [vmem:[%s1124_s0 + $0x28] sm:$0xff]  ;;  %vm593_vm3 = vcmask 261312   ;;  %vm600_vm4 = vcmask 326912   ;;  %vm607_vm5 = vcmask 392512  }
   0x9   :  { %841 = vmatpush3.bf16.msra.mxu0 %v838_v6  ;;  %843 = vmatprep.subr.bf16.mxu1 %v842_v10  ;;  %v30_v15 = vld [vmem:[%s1124_s0 + $0x30] sm:$0xff]  ;;  %v31_v16 = vld [vmem:[%s1124_s0 + $0x38] sm:$0xff]  ;;  %v32_v17 = vld [vmem:[%s1124_s0 + $0x40] sm:$0xff]  ;;  %vm614_vm6 = vcmask 458112   ;;  %vm621_vm7 = vcmask 523712   ;;  %vm628_vm8 = vcmask 589312  }
   0xa   :  { %845 = vmatpush3.bf16.msra.mxu1 %v842_v10  ;;  %v33_v18 = vld [vmem:[%s1124_s0 + $0x48] sm:$0xff]  ;;  %v34_v19 = vld [vmem:[%s1124_s0 + $0x50] sm:$0xff]  ;;  %v35_v20 = vld [vmem:[%s1124_s0 + $0x58] sm:$0xff]  ;;  %vm635_vm9 = vcmask 654912   ;;  %vm642_vm10 = vcmask 720512   ;;  %vm649_vm11 = vcmask 786112  }
   0xb   :  { %v36_v21 = vld [vmem:[%s1124_s0 + $0x60] sm:$0xff]  ;;  %v37_v22 = vld [vmem:[%s1124_s0 + $0x68] sm:$0xff]  ;;  %v38_v23 = vld [vmem:[%s1124_s0 + $0x70] sm:$0xff]  ;;  %vm656_vm12 = vcmask 851712   ;;  %vm663_vm13 = vcmask 917312   ;;  %vm670_vm14 = vcmask 982912  }
   0xc   :  { %779 = vmatmul.mubr.msk.f32.vlgmr.msra.gmra.mrb[0].mxu0 %vm51_vm0, %v25_v9  ;;  %v39_v24 = vld [vmem:[%s1124_s0 + $0x78] sm:$0xff]  ;;  %v263_v25 = vld [vmem:[%s1127_s3 + $0x10] sm:$0xff]  ;;  %v695_v28 = vld [vmem:[%s1126_s2] ss:$0 sm:$0xff]  ;;  %vm677_vm15 = vcmask 1048512  }
   0xd   :  { %781 = vmatprep.mubr.msk.f32.mxu0 %vm51_vm0, %v26_v11  ;;  %v264_v26 = vld [vmem:[%s1127_s3 + $0x18] sm:$0xff] }
   0xe   :  { %v846_v27 = vpack.c.bf16 %v264_v26, %v263_v25 }
  0x10   :  { %782 = vmatmul.mubr.msk.f32.gmra.mrb[2].mxu0 %vm51_vm0, %v27_v12  ;;  %847 = vmatprep.subr.bf16.mxu1 %v846_v27 }
  0x11   :  { %784 = vmatprep.mubr.msk.f32.mxu0 %vm51_vm0, %v28_v13  ;;  %849 = vmatpush3.bf16.msra.mxu1 %v846_v27  ;;  %v1021_v13 = vld [vmem:[%s1128_s4] ss:$0 sm:$0xff]  ;;  %s875_s4 = smov [#allocation2]  }
  0x14   :  { %785 = vmatmul.mubr.msk.f32.gmra.mrb[4].mxu0 %vm51_vm0, %v29_v14 }
  0x15   :  { %787 = vmatprep.mubr.msk.f32.mxu0 %vm51_vm0, %v30_v15 }
  0x18   :  { %788 = vmatmul.mubr.msk.f32.gmra.mrb[6].mxu0 %vm51_vm0, %v31_v16 }
  0x19   :  { %790 = vmatprep.mubr.msk.f32.mxu0 %vm51_vm0, %v32_v17 }
  0x1c   :  { %791 = vmatmul.mubr.msk.f32.gmra.mrb[8].mxu0 %vm51_vm0, %v33_v18  ;;  %v1028_v18 = vld [vmem:[%s1129_s5] ss:$0 sm:$0xff]  ;;  %s687_s5 = sshll.u32 %s875_s4, 4  ;;  %s688_s5 = int_to_ptr.vmem [resolvable:$true] %s687_s5 }
  0x1d   :  { %793 = vmatprep.mubr.msk.f32.mxu0 %vm51_vm0, %v34_v19  ;;  %s851_s22 = scalar_lea.vmem %s688_s5, 16  ;;  %s855_s23 = scalar_lea.vmem %s688_s5, 32 }
  0x1e   :  { %p852_p0 = scmp.ne.s32.totalorder %s688_s5, %s851_s22  ;;  %p856_p1 = scmp.lt.s32.totalorder %s688_s5, %s688_s5 }
  0x1f   :  { %p857_p2 = scmp.lt.s32.totalorder %s855_s23, %s851_s22 }
  0x20   :  { %794 = vmatmul.mubr.msk.f32.gmra.mrb[10].mxu0 %vm51_vm0, %v35_v20 }
  0x21   :  { %796 = vmatprep.mubr.msk.f32.mxu0 %vm51_vm0, %v36_v21  ;;  %p858_p3 = por %p857_p2, %p856_p1 }
  0x23   :  { %p859_p4 = pnand %p858_p3, %p852_p0 }
  0x24   :  { %797 = vmatmul.mubr.msk.f32.gmra.mrb[12].mxu0 %vm51_vm0, %v37_v22 }
  0x25   :  { %799 = vmatprep.mubr.msk.f32.mxu0 %vm51_vm0, %v38_v23 }
  0x28   :  { %800 = vmatmul.mubr.msk.f32.gmra.mrb[14].mxu0 %vm51_vm0, %v39_v24 }
  0xdf   :  { %v780_v29 = vpop.f32.mrb[0].mxu0 }
  0xe0   :  { %v172_v30 = vadd.f32 %v780_v29, %v695_v28  ;;  %v166_v31 = vpop.f32.mrb[1].mxu0 }
  0xe1   :  { %v167_v32 = vadd.f32 %v695_v28, %v166_v31 }
  0xe2   :  { %v246_v35 = vmax.f32 %v172_v30, 0.0 }
  0xe3   :  { %v245_v33 = vmax.f32 %v167_v32, 0.0  ;;  %v783_v34 = vpop.f32.mrb[2].mxu0 }
  0xe4   :  { %v182_v36 = vadd.f32 %v783_v34, %v695_v28  ;;  %v176_v37 = vpop.f32.mrb[3].mxu0 }
  0xe5   :  { %v177_v38 = vadd.f32 %v695_v28, %v176_v37  ;;  %810 = vmatprep.mubr.msk.f32.mxu1 %vm51_vm0, %v245_v33 }
  0xe6   :  { %811 = vmatmul.mubr.msk.f32.vlgmr.msra.gmra.mrb[0].mxu1 %vm51_vm0, %v246_v35  ;;  %v248_v41 = vmax.f32 %v182_v36, 0.0 }
  0xe7   :  { %v247_v39 = vmax.f32 %v177_v38, 0.0  ;;  %v786_v40 = vpop.f32.mrb[4].mxu0 }
  0xe8   :  { %v192_v42 = vadd.f32 %v786_v40, %v695_v28  ;;  %v186_v43 = vpop.f32.mrb[5].mxu0 }
  0xe9   :  { %v187_v44 = vadd.f32 %v695_v28, %v186_v43  ;;  %813 = vmatprep.mubr.msk.f32.mxu1 %vm51_vm0, %v247_v39 }
  0xea   :  { %v250_v45 = vmax.f32 %v192_v42, 0.0  ;;  %814 = vmatmul.mubr.msk.f32.gmra.mrb[2].mxu1 %vm51_vm0, %v248_v41 }
  0xeb   :  { %v249_v46 = vmax.f32 %v187_v44, 0.0  ;;  %v789_v47 = vpop.f32.mrb[6].mxu0 }
  0xec   :  { %v202_v48 = vadd.f32 %v789_v47, %v695_v28  ;;  %v196_v49 = vpop.f32.mrb[7].mxu0 }
  0xed   :  { %v197_v50 = vadd.f32 %v695_v28, %v196_v49  ;;  %816 = vmatprep.mubr.msk.f32.mxu1 %vm51_vm0, %v249_v46 }
  0xee   :  { %v252_v51 = vmax.f32 %v202_v48, 0.0  ;;  %817 = vmatmul.mubr.msk.f32.gmra.mrb[4].mxu1 %vm51_vm0, %v250_v45 }
  0xef   :  { %v251_v52 = vmax.f32 %v197_v50, 0.0  ;;  %v792_v53 = vpop.f32.mrb[8].mxu0 }
  0xf0   :  { %v212_v54 = vadd.f32 %v792_v53, %v695_v28  ;;  %v206_v55 = vpop.f32.mrb[9].mxu0 }
  0xf1   :  { %v207_v56 = vadd.f32 %v695_v28, %v206_v55  ;;  %819 = vmatprep.mubr.msk.f32.mxu1 %vm51_vm0, %v251_v52 }
  0xf2   :  { %v254_v57 = vmax.f32 %v212_v54, 0.0  ;;  %820 = vmatmul.mubr.msk.f32.gmra.mrb[6].mxu1 %vm51_vm0, %v252_v51 }
  0xf3   :  { %v253_v58 = vmax.f32 %v207_v56, 0.0  ;;  %v795_v59 = vpop.f32.mrb[10].mxu0 }
  0xf4   :  { %v222_v60 = vadd.f32 %v795_v59, %v695_v28  ;;  %v216_v61 = vpop.f32.mrb[11].mxu0 }
  0xf5   :  { %v217_v62 = vadd.f32 %v695_v28, %v216_v61  ;;  %822 = vmatprep.mubr.msk.f32.mxu1 %vm51_vm0, %v253_v58 }
  0xf6   :  { %v256_v63 = vmax.f32 %v222_v60, 0.0  ;;  %823 = vmatmul.mubr.msk.f32.gmra.mrb[8].mxu1 %vm51_vm0, %v254_v57 }
  0xf7   :  { %v255_v0 = vmax.f32 %v217_v62, 0.0  ;;  %v798_v1 = vpop.f32.mrb[12].mxu0 }
  0xf8   :  { %v232_v2 = vadd.f32 %v798_v1, %v695_v28  ;;  %v226_v3 = vpop.f32.mrb[13].mxu0 }
  0xf9   :  { %v227_v4 = vadd.f32 %v695_v28, %v226_v3  ;;  %825 = vmatprep.mubr.msk.f32.mxu1 %vm51_vm0, %v255_v0 }
  0xfa   :  { %v258_v5 = vmax.f32 %v232_v2, 0.0  ;;  %826 = vmatmul.mubr.msk.f32.gmra.mrb[10].mxu1 %vm51_vm0, %v256_v63 }
  0xfb   :  { %v257_v6 = vmax.f32 %v227_v4, 0.0  ;;  %v801_v7 = vpop.f32.mrb[14].mxu0 }
  0xfc   :  { %v242_v8 = vadd.f32 %v801_v7, %v695_v28  ;;  %v236_v9 = vpop.f32.mrb[15].mxu0 }
  0xfd   :  { %v237_v10 = vadd.f32 %v695_v28, %v236_v9  ;;  %828 = vmatprep.mubr.msk.f32.mxu1 %vm51_vm0, %v257_v6 }
  0xfe   :  { %v260_v11 = vmax.f32 %v242_v8, 0.0  ;;  %829 = vmatmul.mubr.msk.f32.gmra.mrb[12].mxu1 %vm51_vm0, %v258_v5 }
  0xff   :  { %v259_v12 = vmax.f32 %v237_v10, 0.0 }
 0x101   :  { %831 = vmatprep.mubr.msk.f32.mxu1 %vm51_vm0, %v259_v12 }
 0x102   :  { %832 = vmatmul.mubr.msk.f32.gmra.mrb[14].mxu1 %vm51_vm0, %v260_v11 }
 0x1b9   :  { %v812_v14 = vpop.f32.mrb[0].mxu1 }
 0x1ba   :  { %v392_v15 = vadd.f32 %v812_v14, %v1021_v13  ;;  %v386_v16 = vpop.f32.mrb[1].mxu1 }
 0x1bb   :  { %v387_v17 = vadd.f32 %v1021_v13, %v386_v16 }
 0x1bc   :  { %v466_v19 = vmax.f32 %v392_v15, 0.0 }
 0x1bd   :  { %v465_v20 = vmax.f32 %v387_v17, 0.0  ;;  %v815_v21 = vpop.f32.mrb[2].mxu1 }
 0x1be   :  { %v402_v22 = vadd.f32 %v815_v21, %v1021_v13  ;;  %v396_v23 = vpop.f32.mrb[3].mxu1  ;;  %v489_v24 = vmul.f32 %v1028_v18, %v466_v19 }
 0x1bf   :  { %v397_v25 = vadd.f32 %v1021_v13, %v396_v23  ;;  %v488_v28 = vmul.f32 %v1028_v18, %v465_v20 }
 0x1c0   :  { %v468_v26 = vmax.f32 %v402_v22, 0.0  ;;  %v507_v27 = vsel %vm51_vm0, %v489_v24, 0.0 }
 0x1c1   :  { %v467_v29 = vmax.f32 %v397_v25, 0.0  ;;  %508 = vadd.xlane.f32.xlu0 %v507_v27  ;;  %v818_v30 = vpop.f32.mrb[4].mxu1  ;;  %v504_v37 = vsel %vm51_vm0, %v488_v28, 0.0 }
 0x1c2   :  { %v412_v31 = vadd.f32 %v818_v30, %v1021_v13  ;;  %v406_v32 = vpop.f32.mrb[5].mxu1  ;;  %v491_v33 = vmul.f32 %v1028_v18, %v468_v26 }
 0x1c3   :  { %v407_v34 = vadd.f32 %v1021_v13, %v406_v32  ;;  %v490_v38 = vmul.f32 %v1028_v18, %v467_v29  ;;  %v568_v32 = vlaneseq }
 0x1c4   :  { %v470_v35 = vmax.f32 %v412_v31, 0.0  ;;  %v513_v36 = vsel %vm51_vm0, %v491_v33, 0.0 }
 0x1c5   :  { %v469_v39 = vmax.f32 %v407_v34, 0.0  ;;  %514 = vadd.xlane.f32.xlu1 %v513_v36  ;;  %v821_v40 = vpop.f32.mrb[6].mxu1  ;;  %505 = vadd.xlane.f32.xlu0 %v504_v37  ;;  %v510_v46 = vsel %vm51_vm0, %v490_v38, 0.0  ;;  %v1076_v33 = vand.u32 127, %v568_v32  ;;  %v1078_v34 = vshrl.u32 %v568_v32, 7 }
 0x1c6   :  { %v422_v41 = vadd.f32 %v821_v40, %v1021_v13  ;;  %v416_v42 = vpop.f32.mrb[7].mxu1  ;;  %v493_v47 = vmul.f32 %v1028_v18, %v470_v35 }
 0x1c7   :  { %v417_v43 = vadd.f32 %v1021_v13, %v416_v42  ;;  %v492_v44 = vmul.f32 %v1028_v18, %v469_v39  ;;  %v574_v35 = vadd.s32 4294967288, %v1076_v33  ;;  %v581_v37 = vadd.s32 4294967280, %v1076_v33 }
 0x1c8   :  { %v472_v45 = vmax.f32 %v422_v41, 0.0  ;;  %v519_v56 = vsel %vm51_vm0, %v493_v47, 0.0  ;;  %v588_v38 = vadd.s32 4294967272, %v1076_v33  ;;  %v595_v39 = vadd.s32 4294967264, %v1076_v33 }
 0x1c9   :  { %v471_v48 = vmax.f32 %v417_v43, 0.0  ;;  %v824_v49 = vpop.f32.mrb[8].mxu1  ;;  %511 = vadd.xlane.f32.xlu1 %v510_v46  ;;  %v516_v50 = vsel %vm51_vm0, %v492_v44, 0.0  ;;  %v577_v40 = vsub.s32 %v574_v35, %v1078_v34  ;;  %v602_v43 = vadd.s32 4294967256, %v1076_v33 }
 0x1ca   :  { %v432_v51 = vadd.f32 %v824_v49, %v1021_v13  ;;  %v426_v52 = vpop.f32.mrb[9].mxu1  ;;  %517 = vadd.xlane.f32.xlu0 %v516_v50  ;;  %v495_v57 = vmul.f32 %v1028_v18, %v472_v45  ;;  %v584_v44 = vsub.s32 %v581_v37, %v1078_v34  ;;  %v609_v45 = vadd.s32 4294967248, %v1076_v33 }
 0x1cb   :  { %v427_v53 = vadd.f32 %v1021_v13, %v426_v52  ;;  %v494_v54 = vmul.f32 %v1028_v18, %v471_v48  ;;  %v591_v46 = vsub.s32 %v588_v38, %v1078_v34  ;;  %v598_v48 = vsub.s32 %v595_v39, %v1078_v34 }
 0x1cc   :  { %v474_v55 = vmax.f32 %v432_v51, 0.0  ;;  %v525_v2 = vsel %vm51_vm0, %v495_v57, 0.0  ;;  %v605_v51 = vsub.s32 %v602_v43, %v1078_v34  ;;  %v672_v35 = vadd.s32 4294967176, %v1076_v33 }
 0x1cd   :  { %v473_v58 = vmax.f32 %v427_v53, 0.0  ;;  %v827_v59 = vpop.f32.mrb[10].mxu1  ;;  %520 = vadd.xlane.f32.xlu1 %v519_v56  ;;  %v522_v60 = vsel %vm51_vm0, %v494_v54, 0.0  ;;  %v612_v54 = vsub.s32 %v609_v45, %v1078_v34 }
 0x1ce   :  { %v442_v61 = vadd.f32 %v827_v59, %v1021_v13  ;;  %v436_v62 = vpop.f32.mrb[11].mxu1  ;;  %523 = vadd.xlane.f32.xlu0 %v522_v60  ;;  %v497_v3 = vmul.f32 %v1028_v18, %v474_v55  ;;  %v616_v55 = vadd.s32 4294967240, %v1076_v33  ;;  %v623_v59 = vadd.s32 4294967232, %v1076_v33 }
 0x1cf   :  { %v437_v63 = vadd.f32 %v1021_v13, %v436_v62  ;;  %v496_v0 = vmul.f32 %v1028_v18, %v473_v58 }
 0x1d0   :  { %v476_v1 = vmax.f32 %v442_v61, 0.0  ;;  %v531_v12 = vsel %vm51_vm0, %v497_v3, 0.0  ;;  %v630_v3 = vadd.s32 4294967224, %v1076_v33 }
 0x1d1   :  { %v475_v4 = vmax.f32 %v437_v63, 0.0  ;;  %v830_v5 = vpop.f32.mrb[12].mxu1  ;;  %526 = vadd.xlane.f32.xlu1 %v525_v2  ;;  %v528_v6 = vsel %vm51_vm0, %v496_v0, 0.0  ;;  %v619_v2 = vsub.s32 %v616_v55, %v1078_v34 }
 0x1d2   :  { %v452_v7 = vadd.f32 %v830_v5, %v1021_v13  ;;  %v446_v8 = vpop.f32.mrb[13].mxu1  ;;  %529 = vadd.xlane.f32.xlu0 %v528_v6  ;;  %v499_v14 = vmul.f32 %v1028_v18, %v476_v1  ;;  %v626_v5 = vsub.s32 %v623_v59, %v1078_v34  ;;  %v637_v6 = vadd.s32 4294967216, %v1076_v33 }
 0x1d3   :  { %v447_v9 = vadd.f32 %v1021_v13, %v446_v8  ;;  %v498_v10 = vmul.f32 %v1028_v18, %v475_v4 }
 0x1d4   :  { %v478_v11 = vmax.f32 %v452_v7, 0.0  ;;  %v537_v24 = vsel %vm51_vm0, %v499_v14, 0.0 }
 0x1d5   :  { %v477_v15 = vmax.f32 %v447_v9, 0.0  ;;  %v833_v16 = vpop.f32.mrb[14].mxu1  ;;  %532 = vadd.xlane.f32.xlu1 %v531_v12  ;;  %v534_v17 = vsel %vm51_vm0, %v498_v10, 0.0  ;;  %v644_v12 = vadd.s32 4294967208, %v1076_v33 }
 0x1d6   :  { %v462_v19 = vadd.f32 %v833_v16, %v1021_v13  ;;  %v456_v20 = vpop.f32.mrb[15].mxu1  ;;  %535 = vadd.xlane.f32.xlu0 %v534_v17  ;;  %v501_v25 = vmul.f32 %v1028_v18, %v478_v11  ;;  %v633_v11 = vsub.s32 %v630_v3, %v1078_v34  ;;  %v640_v16 = vsub.s32 %v637_v6, %v1078_v34 }
 0x1d7   :  { %v457_v21 = vadd.f32 %v1021_v13, %v456_v20  ;;  %v500_v22 = vmul.f32 %v1028_v18, %v477_v15  ;;  %v651_v17 = vadd.s32 4294967200, %v1076_v33 }
 0x1d8   :  { %v480_v23 = vmax.f32 %v462_v19, 0.0  ;;  %v543_v29 = vsel %vm51_vm0, %v501_v25, 0.0 }
 0x1d9   :  { %v479_v26 = vmax.f32 %v457_v21, 0.0  ;;  %538 = vadd.xlane.f32.xlu1 %v537_v24  ;;  %v540_v27 = vsel %vm51_vm0, %v500_v22, 0.0  ;;  %v658_v24 = vadd.s32 4294967192, %v1076_v33 }
 0x1da   :  { %541 = vadd.xlane.f32.xlu0 %v540_v27  ;;  %v503_v30 = vmul.f32 %v1028_v18, %v480_v23  ;;  %v647_v23 = vsub.s32 %v644_v12, %v1078_v34  ;;  %v654_v27 = vsub.s32 %v651_v17, %v1078_v34 }
 0x1db   :  { %v502_v28 = vmul.f32 %v1028_v18, %v479_v26  ;;  %v572_v18 = vsub.s32 %v1076_v33, %v1078_v34  ;;  %v661_v32 = vsub.s32 %v658_v24, %v1078_v34 }
 0x1dc   :  { %v549_v31 = vsel %vm51_vm0, %v503_v30, 0.0 }
 0x1dd   :  { %544 = vadd.xlane.f32.xlu1 %v543_v29  ;;  %v546_v13 = vsel %vm51_vm0, %v502_v28, 0.0  ;;  %v665_v28 = vadd.s32 4294967184, %v1076_v33 }
 0x1de   :  { %547 = vadd.xlane.f32.xlu0 %v546_v13 }
 0x1df   :  { %v668_v38 = vsub.s32 %v665_v28, %v1078_v34 }
 0x1e1   :  { %550 = vadd.xlane.f32.xlu1 %v549_v31 }
 0x24e   :  { %v509_v36 = vpop.xlane.xlu0 %508 }
 0x24f   :  { %v578_v49 = vrot.slane %v509_v36, %v577_v40 }
 0x252   :  { %v515_v41 = vpop.xlane.xlu1 %514  ;;  %v506_v42 = vpop.xlane.xlu0 %505 }
 0x253   :  { %v573_v47 = vrot.slane %v506_v42, %v572_v18  ;;  %v592_v56 = vrot.slane %v515_v41, %v591_v46  ;;  %v675_v42 = vsub.s32 %v672_v35, %v1078_v34 }
 0x255   :  { %v580_v57 = vsel %vm579_vm1, %v578_v49, %v573_v47 }
 0x256   :  { %v512_v50 = vpop.xlane.xlu1 %511 }
 0x257   :  { %v585_v52 = vrot.slane %v512_v50, %v584_v44  ;;  %v518_v53 = vpop.xlane.xlu0 %517 }
 0x258   :  { %v599_v58 = vrot.slane %v518_v53, %v598_v48 }
 0x259   :  { %v587_v60 = vsel %vm586_vm2, %v585_v52, %v580_v57 }
 0x25a   :  { %v594_v61 = vsel %vm593_vm3, %v592_v56, %v587_v60  ;;  %v521_v62 = vpop.xlane.xlu1 %520 }
 0x25b   :  { %v601_v63 = vsel %vm600_vm4, %v599_v58, %v594_v61  ;;  %v606_v0 = vrot.slane %v521_v62, %v605_v51  ;;  %v524_v1 = vpop.xlane.xlu0 %523 }
 0x25c   :  { %v613_v4 = vrot.slane %v524_v1, %v612_v54 }
 0x25d   :  { %v608_v7 = vsel %vm607_vm5, %v606_v0, %v601_v63 }
 0x25e   :  { %v527_v8 = vpop.xlane.xlu1 %526  ;;  %v615_v14 = vsel %vm614_vm6, %v613_v4, %v608_v7 }
 0x25f   :  { %v620_v9 = vrot.slane %v527_v8, %v619_v2  ;;  %v530_v10 = vpop.xlane.xlu0 %529 }
 0x260   :  { %v627_v15 = vrot.slane %v530_v10, %v626_v5 }
 0x261   :  { %v622_v19 = vsel %vm621_vm7, %v620_v9, %v615_v14 }
 0x262   :  { %v533_v20 = vpop.xlane.xlu1 %532  ;;  %v629_v25 = vsel %vm628_vm8, %v627_v15, %v622_v19 }
 0x263   :  { %v634_v21 = vrot.slane %v533_v20, %v633_v11  ;;  %v536_v22 = vpop.xlane.xlu0 %535 }
 0x264   :  { %v641_v26 = vrot.slane %v536_v22, %v640_v16 }
 0x265   :  { %v636_v29 = vsel %vm635_vm9, %v634_v21, %v629_v25 }
 0x266   :  { %v539_v30 = vpop.xlane.xlu1 %538  ;;  %v643_v36 = vsel %vm642_vm10, %v641_v26, %v636_v29 }
 0x267   :  { %v648_v13 = vrot.slane %v539_v30, %v647_v23  ;;  %v542_v31 = vpop.xlane.xlu0 %541 }
 0x268   :  { %v655_v37 = vrot.slane %v542_v31, %v654_v27 }
 0x269   :  { %v650_v18 = vsel %vm649_vm11, %v648_v13, %v643_v36 }
 0x26a   :  { %v545_v39 = vpop.xlane.xlu1 %544  ;;  %v657_v43 = vsel %vm656_vm12, %v655_v37, %v650_v18 }
 0x26b   :  { %v662_v40 = vrot.slane %v545_v39, %v661_v32  ;;  %v548_v41 = vpop.xlane.xlu0 %547 }
 0x26c   :  { %v669_v44 = vrot.slane %v548_v41, %v668_v38 }
 0x26d   :  { %v664_v45 = vsel %vm663_vm13, %v662_v40, %v657_v43 }
 0x26e   :  { %v551_v46 = vpop.xlane.xlu1 %550  ;;  %v671_v47 = vsel %vm670_vm14, %v669_v44, %v664_v45 }
 0x26f   :  { %v676_v33 = vrot.slane %v551_v46, %v675_v42 }
 0x271   :  { %v678_v48 = vsel %vm677_vm15, %v676_v33, %v671_v47 }
 0x272   :  { %680 = vst [vmem:[#allocation2] sm:$0x1] %v678_v48 }
 0x273   :  { %862 = shalt.err (!%p859_p4)
}
 0x274   :  { %s863_s26 = scalar_lea.hbm %s1130_s6, 16 }
 0x275   :  { %p864_p5 = scmp.ne.s32.totalorder %s1130_s6, %s863_s26  ;;  %p867_p6 = scmp.lt.u32.totalorder %s863_s26, %s1130_s6 }
 0x277   :  { %p869_p7 = pnand %p867_p6, %p864_p5 }
 0x279   :  { %872 = shalt.err (!%p869_p7)
}
 0x27a   :  { %690 = dma.vmem_to_hbm [thread:$0]  %s688_s5, 16, %s1130_s6, [#allocation3]  }
 0x27b   :  { %873 = dma.done.wait [#allocation3], 16  }
 0x27c   :  { %874 = vsyncadd [#allocation3], 4294967280 }
 0x27d   :  { %694 = vsyncpa [#allocation3], 1 }

</bundles_post_ra>
